<compile_context>
chip_gen: v7x
topology: tpu7x:2x2x1
jax: 0.10.0
libtpu: 0.0.40
codegen_flags: <defaults>
</compile_context>

<pallas_src>
import functools

import jax
import jax.numpy as jnp
from jax.experimental import pallas as pl
from jax.experimental.pallas import tpu as pltpu

_EPS = 1e-5
_VMEM_LIMIT = 48 * 1024 * 1024  # scoped-VMEM budget, safe on v5e/v6e and v7x (64 MiB)


# --------------------------------------------------------------------------
# small helpers
# --------------------------------------------------------------------------
def _round_up(x, m):
    return ((x + m - 1) // m) * m


def _pad2d(a, rows, cols):
    r, c = a.shape
    if r == rows and c == cols:
        return a
    return jnp.pad(a, ((0, rows - r), (0, cols - c)))


def _pad1d(v, n):
    if v.shape[0] == n:
        return v
    return jnp.pad(v, (0, n - v.shape[0]))


def _choose_tm(m):
    """Row tile: multiple of 16, <=1024; >=2 tiles when M is large (megacore)."""
    mr = _round_up(m, 16)
    if mr <= 512:
        return mr
    nmt = max(2, -(-mr // 1024))          # at least two M tiles, each <= ~1024 rows
    return _round_up(-(-mr // nmt), 16)


def _choose_tk(kp):
    """kp is a multiple of 128; largest 128-multiple divisor of kp <= 2048."""
    if kp <= 2048:
        return kp
    units = kp // 128
    best = 1
    for d in range(1, min(units, 16) + 1):
        if units % d == 0:
            best = d
    return best * 128


def _ew_tile(mp):
    """Row tile for the memory-bound elementwise kernel: largest multiple-of-16
    divisor of mp that is <= 1024 and leaves >= 2 programs (megacore)."""
    if mp < 512:
        return mp
    best = mp
    for t in range(16, min(1024, mp // 2) + 1, 16):
        if mp % t == 0:
            best = t
    return best


# --------------------------------------------------------------------------
# Pallas kernels
# --------------------------------------------------------------------------
def _conv_stats_kernel(p_ref, w_ref, y_ref, psum_ref, pssq_ref, acc_ref, *, tk):
    """K-tiled bf16 matmul (VMEM-resident weight) with f32 accumulator
    + per-M-tile BN partial statistics emitted from the f32 accumulator."""
    k = pl.program_id(1)

    @pl.when(k == 0)
    def _():
        acc_ref[...] = jnp.zeros_like(acc_ref)

    start = pl.multiple_of(k * tk, 128)
    acc_ref[...] += jnp.dot(p_ref[...], w_ref[pl.ds(start, tk), :],
                            preferred_element_type=jnp.float32)

    @pl.when(k == pl.num_programs(1) - 1)
    def _():
        acc = acc_ref[...]
        y_ref[...] = acc.astype(y_ref.dtype)
        psum_ref[...] = jnp.sum(acc, axis=0, keepdims=True)[None]        # (1,1,Cp)
        pssq_ref[...] = jnp.sum(acc * acc, axis=0, keepdims=True)[None]  # (1,1,Cp)


def _bn_add_relu_kernel(y_ref, sc_ref, s2_ref, b2_ref, ssc_ref, bsc_ref, o_ref):
    """out = max(0, bn2(conv2) + bn_sc(shortcut)) stored as bf16."""
    main = y_ref[...].astype(jnp.float32) * s2_ref[...] + b2_ref[...]
    short = sc_ref[...].astype(jnp.float32) * ssc_ref[...] + bsc_ref[...]
    o_ref[...] = jnp.maximum(main + short, 0.0).astype(o_ref.dtype)


# --------------------------------------------------------------------------
# Pallas wrappers
# --------------------------------------------------------------------------
def conv_matmul_stats(patches, w):
    """patches [M,K] @ w [K,C] on the MXU in bf16 with f32 accumulation.

    Returns:
      y     : [Mp, Cp] bf16  (Mp = M rounded up to the row tile,
                              Cp = C rounded up to 128; pad region is zero)
      sums  : [Cp] f32  per-channel sum  over the M valid rows
      sumsq : [Cp] f32  per-channel sum of squares over the M valid rows
    """
    M, K = patches.shape
    _, C = w.shape

    Cp = _round_up(C, 128)
    Kp = _round_up(K, 128)
    tk = _choose_tk(Kp)
    tm = _choose_tm(M)
    Mp = _round_up(M, tm)
    nmt, nkt = Mp // tm, Kp // tk

    p = _pad2d(patches.astype(jnp.bfloat16), Mp, Kp)
    wp = _pad2d(w.astype(jnp.bfloat16), Kp, Cp)

    y, psum, pssq = pl.pallas_call(
        functools.partial(_conv_stats_kernel, tk=tk),
        out_shape=(jax.ShapeDtypeStruct((Mp, Cp), jnp.bfloat16),
                   jax.ShapeDtypeStruct((nmt, 1, Cp), jnp.float32),
                   jax.ShapeDtypeStruct((nmt, 1, Cp), jnp.float32)),
        grid_spec=pltpu.PrefetchScalarGridSpec(
            num_scalar_prefetch=0,
            grid=(nmt, nkt),
            in_specs=[pl.BlockSpec((tm, tk), lambda i, k: (i, k)),
                      # full weight resident in VMEM (constant block index)
                      pl.BlockSpec((Kp, Cp), lambda i, k: (0, 0))],
            out_specs=(pl.BlockSpec((tm, Cp), lambda i, k: (i, 0)),
                       pl.BlockSpec((1, 1, Cp), lambda i, k: (i, 0, 0)),
                       pl.BlockSpec((1, 1, Cp), lambda i, k: (i, 0, 0))),
            scratch_shapes=[pltpu.VMEM((tm, Cp), jnp.float32)]),
        compiler_params=pltpu.CompilerParams(
            dimension_semantics=("parallel", "arbitrary"),
            vmem_limit_bytes=_VMEM_LIMIT),
    )(p, wp)

    sums = jnp.sum(psum[:, 0, :], axis=0)      # zero-padded rows add nothing
    sumsq = jnp.sum(pssq[:, 0, :], axis=0)
    return y, sums, sumsq


def bn_add_relu(y2, y_sc, s2, b2, s_sc, b_sc):
    """max(0, y2*s2+b2 + y_sc*s_sc+b_sc) -> bf16 [Mp,Cp] (lane-dense store)."""
    Mp, Cp = y2.shape
    tm = _ew_tile(Mp)
    vec = pl.BlockSpec((1, Cp), lambda i: (0, 0))
    return pl.pallas_call(
        _bn_add_relu_kernel,
        out_shape=jax.ShapeDtypeStruct((Mp, Cp), jnp.bfloat16),
        grid=(Mp // tm,),
        in_specs=[pl.BlockSpec((tm, Cp), lambda i: (i, 0)),
                  pl.BlockSpec((tm, Cp), lambda i: (i, 0)),
                  vec, vec, vec, vec],
        out_specs=pl.BlockSpec((tm, Cp), lambda i: (i, 0)),
        compiler_params=pltpu.CompilerParams(
            dimension_semantics=("parallel",),
            vmem_limit_bytes=_VMEM_LIMIT),
    )(y2, y_sc, s2, b2, s_sc, b_sc)


# --------------------------------------------------------------------------
# Plain-JAX glue
# --------------------------------------------------------------------------
def im2col_3x3(x_nhwc, stride):
    """Extract 3x3 patches with padding=1. Returns ([M, 9*C], (N,Ho,Wo)).

    Input is bf16 so the materialized patch matrix is half the f32 bytes.
    TODO(synk): move patch extraction into the conv kernel (halo DMA) so the
    9x patch matrix never hits HBM.
    """
    N, H, W, C = x_nhwc.shape
    Ho = (H - 1) // stride + 1
    Wo = (W - 1) // stride + 1
    xp = jnp.pad(x_nhwc, ((0, 0), (1, 1), (1, 1), (0, 0)))
    cols = []
    for kh in range(3):
        for kw in range(3):
            cols.append(xp[:, kh:kh + (Ho - 1) * stride + 1:stride,
                            kw:kw + (Wo - 1) * stride + 1:stride, :])
    patches = jnp.concatenate(cols, axis=-1)          # order: (kh, kw, cin)
    return patches.reshape(N * Ho * Wo, 9 * C), (N, Ho, Wo)


def _w3x3_to_matmul(w_oihw):
    """[Cout, Cin, 3, 3] -> [9*Cin, Cout], matching im2col (kh,kw,cin) order."""
    cout, cin = w_oihw.shape[0], w_oihw.shape[1]
    return jnp.transpose(w_oihw, (2, 3, 1, 0)).reshape(9 * cin, cout)


def _bn_scale_bias(sums, sumsq, m, gamma_p, beta_p, eps=_EPS):
    """Fold batch-statistics BN into per-channel scale/bias, shape (1, Cp).

    gamma_p/beta_p are zero-padded to Cp, so padded channels get scale=bias=0.
    """
    mean = sums / m
    var = jnp.maximum(sumsq / m - mean * mean, 0.0)    # clamp cancellation noise
    scale = gamma_p * jax.lax.rsqrt(var + eps)
    bias = beta_p - mean * scale
    return scale[None, :], bias[None, :]


# --------------------------------------------------------------------------
# Parameters
# --------------------------------------------------------------------------
def init_params(key, in_planes, planes, stride):
    k1, k2, k3 = jax.random.split(key, 3)

    def conv_init(k, shape):                           # kaiming-like, deterministic
        fan_in = shape[1] * shape[2] * shape[3]
        return jax.random.normal(k, shape, jnp.float32) * (2.0 / fan_in) ** 0.5

    params = {
        "conv1_w": conv_init(k1, (planes, in_planes, 3, 3)),
        "conv2_w": conv_init(k2, (planes, planes, 3, 3)),
        "bn1_gamma": jnp.ones((planes,), jnp.float32),
        "bn1_beta": jnp.zeros((planes,), jnp.float32),
        "bn2_gamma": jnp.ones((planes,), jnp.float32),
        "bn2_beta": jnp.zeros((planes,), jnp.float32),
    }
    if stride != 1 or in_planes != planes:
        params["sc_w"] = conv_init(k3, (planes, in_planes, 1, 1))
        params["bnsc_gamma"] = jnp.ones((planes,), jnp.float32)
        params["bnsc_beta"] = jnp.zeros((planes,), jnp.float32)
    return params


# --------------------------------------------------------------------------
# BasicBlock forward
# --------------------------------------------------------------------------
@functools.partial(jax.jit, static_argnums=(2,))
def basic_block_forward(params, x_nchw, stride):
    x_bf = jnp.transpose(x_nchw, (0, 2, 3, 1)).astype(jnp.bfloat16)   # NHWC bf16
    N, H, W, cin = x_bf.shape
    planes = params["conv1_w"].shape[0]
    Cp = _round_up(planes, 128)

    g1 = _pad1d(params["bn1_gamma"], Cp)
    b1 = _pad1d(params["bn1_beta"], Cp)
    g2 = _pad1d(params["bn2_gamma"], Cp)
    b2 = _pad1d(params["bn2_beta"], Cp)

    # ---- conv1 (+ BN batch-stat partials) -----------------------------------
    p1, (_, Ho, Wo) = im2col_3x3(x_bf, stride)
    M = N * Ho * Wo
    y1, s1, ss1 = conv_matmul_stats(p1, _w3x3_to_matmul(params["conv1_w"]))
    sc1, bi1 = _bn_scale_bias(s1, ss1, M, g1, b1)

    # BN1 affine + ReLU as plain jnp ops so XLA fuses them into conv2's im2col
    # (no separate Pallas elementwise kernel / extra HBM round trip).
    a1 = jnp.maximum(
        y1[:M, :planes].astype(jnp.float32) * sc1[:, :planes] + bi1[:, :planes],
        0.0).astype(jnp.bfloat16).reshape(N, Ho, Wo, planes)

    # ---- conv2 + bn2 ---------------------------------------------------------
    p2, _ = im2col_3x3(a1, 1)
    y2, s2, ss2 = conv_matmul_stats(p2, _w3x3_to_matmul(params["conv2_w"]))
    sc2, bi2 = _bn_scale_bias(s2, ss2, M, g2, b2)
    Mp = y2.shape[0]

    # ---- shortcut ------------------------------------------------------------
    if "sc_w" in params:
        xs = x_bf[:, ::stride, ::stride, :].reshape(M, cin)            # 1x1 conv gather
        wsc = jnp.transpose(params["sc_w"], (2, 3, 1, 0)).reshape(cin, planes)
        y_sc, s_sc, ss_sc = conv_matmul_stats(xs, wsc)
        gsc = _pad1d(params["bnsc_gamma"], Cp)
        bsc = _pad1d(params["bnsc_beta"], Cp)
        scs, bis = _bn_scale_bias(s_sc, ss_sc, M, gsc, bsc)
    else:                                                              # identity shortcut
        y_sc = _pad2d(x_bf.reshape(M, planes), Mp, Cp)                 # bf16, fused pad
        scs = jnp.ones((1, Cp), jnp.float32)
        bis = jnp.zeros((1, Cp), jnp.float32)

    # ---- bn2 + shortcut add + relu (bf16 store) ------------------------------
    out = bn_add_relu(y2, y_sc, sc2, bi2, scs, bis)                    # (Mp, Cp) bf16
    out = out[:M, :planes].astype(jnp.float32).reshape(N, Ho, Wo, planes)
    return jnp.transpose(out, (0, 3, 1, 2))                            # -> NCHW f32


# --------------------------------------------------------------------------
# Pure-JAX reference (for correctness check)
# --------------------------------------------------------------------------
def reference_forward(params, x_nchw, stride, eps=_EPS):
    def conv(x, w, s, pad):
        return jax.lax.conv_general_dilated(
            x, w, (s, s), ((pad, pad), (pad, pad)),
            dimension_numbers=("NCHW", "OIHW", "NCHW"))

    def bn(y, g, b):
        mean = jnp.mean(y, axis=(0, 2, 3), keepdims=True)
        var = jnp.mean((y - mean) ** 2, axis=(0, 2, 3), keepdims=True)
        return (y - mean) * jax.lax.rsqrt(var + eps) * g[None, :, None, None] \
            + b[None, :, None, None]

    out = conv(x_nchw, params["conv1_w"], stride, 1)
    out = jnp.maximum(bn(out, params["bn1_gamma"], params["bn1_beta"]), 0.0)
    out = bn(conv(out, params["conv2_w"], 1, 1),
             params["bn2_gamma"], params["bn2_beta"])
    if "sc_w" in params:
        sc = bn(conv(x_nchw, params["sc_w"], stride, 0),
                params["bnsc_gamma"], params["bnsc_beta"])
    else:
        sc = x_nchw
    return jnp.maximum(out + sc, 0.0)


# --------------------------------------------------------------------------
if __name__ == "__main__":
    key = jax.random.PRNGKey(0)
    configs = [
        dict(in_planes=4, planes=8, stride=2, hw=16),   # conv-BN shortcut path
        dict(in_planes=8, planes=8, stride=1, hw=16),   # identity shortcut path
    ]
    for cfg in configs:
        key, kx, kp = jax.random.split(key, 3)
        x = jax.random.normal(
            kx, (2, cfg["in_planes"], cfg["hw"], cfg["hw"]), jnp.float32)
        params = init_params(kp, cfg["in_planes"], cfg["planes"], cfg["stride"])

        out = jax.block_until_ready(basic_block_forward(params, x, cfg["stride"]))
        ref = reference_forward(params, x, cfg["stride"])

        ho = (cfg["hw"] - 1) // cfg["stride"] + 1
        assert out.shape == ref.shape == (2, cfg["planes"], ho, ho), out.shape
        # bf16 MXU operands + bf16 activation/output storage -> modest tolerance
        if not bool(jnp.allclose(out, ref, rtol=5e-2, atol=5e-2)):
            max_err = float(jnp.max(jnp.abs(out - ref)))
            raise AssertionError(
                f"Pallas BasicBlock mismatch (cfg={cfg}, max_abs_err={max_err})")

    print("KERNEL_OK")
</pallas_src>

<mosaic_0001>
module attributes {stable_mosaic.version = 11 : i64} {
  func.func @_conv_stats_kernel(%arg0: i32, %arg1: i32, %arg2: memref<128x128xbf16, #tpu.memory_space<vmem>>, %arg3: memref<128x128xbf16, #tpu.memory_space<vmem>>, %arg4: memref<128x128xbf16, #tpu.memory_space<vmem>>, %arg5: memref<1x1x128xf32, #tpu.memory_space<vmem>>, %arg6: memref<1x1x128xf32, #tpu.memory_space<vmem>>, %arg7: memref<128x128xf32, #tpu.memory_space<vmem>>) attributes {dimension_semantics = [#tpu.dimension_semantics<parallel>, #tpu.dimension_semantics<arbitrary>], iteration_bounds = array<i64: 1, 1>, scalar_prefetch = 0 : i64, scratch_operands = 1 : i64, tpu.core_type = #tpu.core_type<tc>, window_params = [{transform_indices = @transform_0, window_bounds = array<i64: 128, 128>}, {pipeline_mode = #tpu.pipeline_mode<synchronous>, transform_indices = @transform_1, window_bounds = array<i64: 128, 128>}, {transform_indices = @transform_2, window_bounds = array<i64: 128, 128>}, {transform_indices = @transform_3, window_bounds = array<i64: 1, 1, 128>}, {transform_indices = @transform_4, window_bounds = array<i64: 1, 1, 128>}]} {
    %c0_i32 = arith.constant 0 : i32
    %0 = arith.cmpi eq, %arg1, %c0_i32 : i32
    %1 = arith.extui %0 : i1 to i32
    %c0_i32_0 = arith.constant 0 : i32
    %2 = arith.cmpi ne, %1, %c0_i32_0 : i32
    scf.if %2 {
      %cst_9 = arith.constant 0.000000e+00 : f32
      %15 = vector.broadcast %cst_9 : f32 to vector<128x128xf32>
      %c0_10 = arith.constant 0 : index
      %c0_11 = arith.constant 0 : index
      %16 = vector.load %arg7[%c0_10, %c0_11] : memref<128x128xf32, #tpu.memory_space<vmem>>, vector<128x128xf32>
      tpu.vector_store %arg7[%c0_10, %c0_11], %15 {strides = array<i32>} : memref<128x128xf32, #tpu.memory_space<vmem>>, vector<128x128xf32>,
    } else {
    }
    %c128_i32 = arith.constant 128 : i32
    %3 = arith.muli %arg1, %c128_i32 : i32
    %4 = tpu.assume_multiple %3, 128 : i32
    %c0 = arith.constant 0 : index
    %c0_1 = arith.constant 0 : index
    %5 = vector.load %arg7[%c0, %c0_1] : memref<128x128xf32, #tpu.memory_space<vmem>>, vector<128x128xf32>
    %c0_2 = arith.constant 0 : index
    %c0_3 = arith.constant 0 : index
    %6 = vector.load %arg2[%c0_2, %c0_3] : memref<128x128xbf16, #tpu.memory_space<vmem>>, vector<128x128xbf16>
    %7 = arith.index_cast %4 : i32 to index
    %c0_4 = arith.constant 0 : index
    %8 = vector.load %arg3[%7, %c0_4] : memref<128x128xbf16, #tpu.memory_space<vmem>>, vector<128x128xbf16>
    %cst = arith.constant dense<0.000000e+00> : vector<128x128xf32>
    %9 = tpu.matmul %6, %8, %cst {dimension_numbers = #tpu.dot_dimension_numbers<[1], [0], [0], [1], [0, 0, 1, 1], [], []>} : vector<128x128xbf16>, vector<128x128xbf16>, vector<128x128xf32> -> vector<128x128xf32>
    %10 = arith.addf %5, %9 : vector<128x128xf32>
    %c0_5 = arith.constant 0 : index
    %c0_6 = arith.constant 0 : index
    %11 = vector.load %arg7[%c0_5, %c0_6] : memref<128x128xf32, #tpu.memory_space<vmem>>, vector<128x128xf32>
    tpu.vector_store %arg7[%c0_5, %c0_6], %10 {strides = array<i32>} : memref<128x128xf32, #tpu.memory_space<vmem>>, vector<128x128xf32>,
    %c0_i32_7 = arith.constant 0 : i32
    %12 = arith.cmpi eq, %arg1, %c0_i32_7 : i32
    %13 = arith.extui %12 : i1 to i32
    %c0_i32_8 = arith.constant 0 : i32
    %14 = arith.cmpi ne, %13, %c0_i32_8 : i32
    scf.if %14 {
      %c0_9 = arith.constant 0 : index
      %c0_10 = arith.constant 0 : index
      %15 = vector.load %arg7[%c0_9, %c0_10] : memref<128x128xf32, #tpu.memory_space<vmem>>, vector<128x128xf32>
      %16 = arith.truncf %15 : vector<128x128xf32> to vector<128x128xbf16>
      %c0_11 = arith.constant 0 : index
      %c0_12 = arith.constant 0 : index
      %17 = vector.load %arg4[%c0_11, %c0_12] : memref<128x128xbf16, #tpu.memory_space<vmem>>, vector<128x128xbf16>
      tpu.vector_store %arg4[%c0_11, %c0_12], %16 {strides = array<i32>} : memref<128x128xbf16, #tpu.memory_space<vmem>>, vector<128x128xbf16>,
      %cst_13 = arith.constant dense<0.000000e+00> : vector<128xf32>
      %18 = vector.multi_reduction <add>, %15, %cst_13 [0] : vector<128x128xf32> to vector<128xf32>
      %19 = vector.shape_cast %18 : vector<128xf32> to vector<1x128xf32>
      %20 = vector.shape_cast %19 : vector<1x128xf32> to vector<1x1x128xf32>
      %c0_14 = arith.constant 0 : index
      %c0_15 = arith.constant 0 : index
      %c0_16 = arith.constant 0 : index
      %21 = vector.load %arg5[%c0_14, %c0_15, %c0_16] : memref<1x1x128xf32, #tpu.memory_space<vmem>>, vector<1x1x128xf32>
      tpu.vector_store %arg5[%c0_14, %c0_15, %c0_16], %20 {strides = array<i32>} : memref<1x1x128xf32, #tpu.memory_space<vmem>>, vector<1x1x128xf32>,
      %22 = arith.mulf %15, %15 : vector<128x128xf32>
      %cst_17 = arith.constant dense<0.000000e+00> : vector<128xf32>
      %23 = vector.multi_reduction <add>, %22, %cst_17 [0] : vector<128x128xf32> to vector<128xf32>
      %24 = vector.shape_cast %23 : vector<128xf32> to vector<1x128xf32>
      %25 = vector.shape_cast %24 : vector<1x128xf32> to vector<1x1x128xf32>
      %c0_18 = arith.constant 0 : index
      %c0_19 = arith.constant 0 : index
      %c0_20 = arith.constant 0 : index
      %26 = vector.load %arg6[%c0_18, %c0_19, %c0_20] : memref<1x1x128xf32, #tpu.memory_space<vmem>>, vector<1x1x128xf32>
      tpu.vector_store %arg6[%c0_18, %c0_19, %c0_20], %25 {strides = array<i32>} : memref<1x1x128xf32, #tpu.memory_space<vmem>>, vector<1x1x128xf32>,
    } else {
    }
    return
  }
  func.func @transform_0(%arg0: i32, %arg1: i32) -> (i32, i32) {
    %c0_i32 = arith.constant 0 : i32
    return %arg0, %arg1 : i32, i32
  }
  func.func @transform_1(%arg0: i32, %arg1: i32) -> (i32, i32) {
    %c0_i32 = arith.constant 0 : i32
    %c0_i32_0 = arith.constant 0 : i32
    %c0_i32_1 = arith.constant 0 : i32
    return %c0_i32, %c0_i32_0 : i32, i32
  }
  func.func @transform_2(%arg0: i32, %arg1: i32) -> (i32, i32) {
    %c0_i32 = arith.constant 0 : i32
    %c0_i32_0 = arith.constant 0 : i32
    return %arg0, %c0_i32 : i32, i32
  }
  func.func @transform_3(%arg0: i32, %arg1: i32) -> (i32, i32, i32) {
    %c0_i32 = arith.constant 0 : i32
    %c0_i32_0 = arith.constant 0 : i32
    %c0_i32_1 = arith.constant 0 : i32
    return %arg0, %c0_i32, %c0_i32_0 : i32, i32, i32
  }
  func.func @transform_4(%arg0: i32, %arg1: i32) -> (i32, i32, i32) {
    %c0_i32 = arith.constant 0 : i32
    %c0_i32_0 = arith.constant 0 : i32
    %c0_i32_1 = arith.constant 0 : i32
    return %arg0, %c0_i32, %c0_i32_0 : i32, i32, i32
  }
}

module attributes {stable_mosaic.version = 11 : i64} {
  func.func @_bn_add_relu_kernel(%arg0: i32, %arg1: memref<128x128xbf16, #tpu.memory_space<vmem>>, %arg2: memref<128x128xbf16, #tpu.memory_space<vmem>>, %arg3: memref<1x128xf32, #tpu.memory_space<vmem>>, %arg4: memref<1x128xf32, #tpu.memory_space<vmem>>, %arg5: memref<1x128xf32, #tpu.memory_space<vmem>>, %arg6: memref<1x128xf32, #tpu.memory_space<vmem>>, %arg7: memref<128x128xbf16, #tpu.memory_space<vmem>>) attributes {dimension_semantics = [#tpu.dimension_semantics<parallel>], iteration_bounds = array<i64: 1>, scalar_prefetch = 0 : i64, scratch_operands = 0 : i64, tpu.core_type = #tpu.core_type<tc>, window_params = [{transform_indices = @transform_0, window_bounds = array<i64: 128, 128>}, {transform_indices = @transform_1, window_bounds = array<i64: 128, 128>}, {pipeline_mode = #tpu.pipeline_mode<synchronous>, transform_indices = @transform_2, window_bounds = array<i64: 1, 128>}, {pipeline_mode = #tpu.pipeline_mode<synchronous>, transform_indices = @transform_3, window_bounds = array<i64: 1, 128>}, {pipeline_mode = #tpu.pipeline_mode<synchronous>, transform_indices = @transform_4, window_bounds = array<i64: 1, 128>}, {pipeline_mode = #tpu.pipeline_mode<synchronous>, transform_indices = @transform_5, window_bounds = array<i64: 1, 128>}, {transform_indices = @transform_6, window_bounds = array<i64: 128, 128>}]} {
    %c0 = arith.constant 0 : index
    %c0_0 = arith.constant 0 : index
    %0 = vector.load %arg1[%c0, %c0_0] : memref<128x128xbf16, #tpu.memory_space<vmem>>, vector<128x128xbf16>
    %1 = arith.extf %0 : vector<128x128xbf16> to vector<128x128xf32>
    %c0_1 = arith.constant 0 : index
    %c0_2 = arith.constant 0 : index
    %2 = vector.load %arg3[%c0_1, %c0_2] : memref<1x128xf32, #tpu.memory_space<vmem>>, vector<1x128xf32>
    %3 = vector.broadcast %2 : vector<1x128xf32> to vector<128x128xf32>
    %4 = arith.mulf %1, %3 : vector<128x128xf32>
    %c0_3 = arith.constant 0 : index
    %c0_4 = arith.constant 0 : index
    %5 = vector.load %arg4[%c0_3, %c0_4] : memref<1x128xf32, #tpu.memory_space<vmem>>, vector<1x128xf32>
    %6 = vector.broadcast %5 : vector<1x128xf32> to vector<128x128xf32>
    %7 = arith.addf %4, %6 : vector<128x128xf32>
    %c0_5 = arith.constant 0 : index
    %c0_6 = arith.constant 0 : index
    %8 = vector.load %arg2[%c0_5, %c0_6] : memref<128x128xbf16, #tpu.memory_space<vmem>>, vector<128x128xbf16>
    %9 = arith.extf %8 : vector<128x128xbf16> to vector<128x128xf32>
    %c0_7 = arith.constant 0 : index
    %c0_8 = arith.constant 0 : index
    %10 = vector.load %arg5[%c0_7, %c0_8] : memref<1x128xf32, #tpu.memory_space<vmem>>, vector<1x128xf32>
    %11 = vector.broadcast %10 : vector<1x128xf32> to vector<128x128xf32>
    %12 = arith.mulf %9, %11 : vector<128x128xf32>
    %c0_9 = arith.constant 0 : index
    %c0_10 = arith.constant 0 : index
    %13 = vector.load %arg6[%c0_9, %c0_10] : memref<1x128xf32, #tpu.memory_space<vmem>>, vector<1x128xf32>
    %14 = vector.broadcast %13 : vector<1x128xf32> to vector<128x128xf32>
    %15 = arith.addf %12, %14 : vector<128x128xf32>
    %16 = arith.addf %7, %15 : vector<128x128xf32>
    %cst = arith.constant 0.000000e+00 : f32
    %17 = vector.broadcast %cst : f32 to vector<128x128xf32>
    %18 = arith.maximumf %16, %17 : vector<128x128xf32>
    %19 = arith.truncf %18 : vector<128x128xf32> to vector<128x128xbf16>
    %c0_11 = arith.constant 0 : index
    %c0_12 = arith.constant 0 : index
    %20 = vector.load %arg7[%c0_11, %c0_12] : memref<128x128xbf16, #tpu.memory_space<vmem>>, vector<128x128xbf16>
    tpu.vector_store %arg7[%c0_11, %c0_12], %19 {strides = array<i32>} : memref<128x128xbf16, #tpu.memory_space<vmem>>, vector<128x128xbf16>,
    return
  }
  func.func @transform_0(%arg0: i32) -> (i32, i32) {
    %c0_i32 = arith.constant 0 : i32
    %c0_i32_0 = arith.constant 0 : i32
    return %arg0, %c0_i32 : i32, i32
  }
  func.func @transform_1(%arg0: i32) -> (i32, i32) {
    %c0_i32 = arith.constant 0 : i32
    %c0_i32_0 = arith.constant 0 : i32
    return %arg0, %c0_i32 : i32, i32
  }
  func.func @transform_2(%arg0: i32) -> (i32, i32) {
    %c0_i32 = arith.constant 0 : i32
    %c0_i32_0 = arith.constant 0 : i32
    %c0_i32_1 = arith.constant 0 : i32
    return %c0_i32, %c0_i32_0 : i32, i32
  }
  func.func @transform_3(%arg0: i32) -> (i32, i32) {
    %c0_i32 = arith.constant 0 : i32
    %c0_i32_0 = arith.constant 0 : i32
    %c0_i32_1 = arith.constant 0 : i32
    return %c0_i32, %c0_i32_0 : i32, i32
  }
  func.func @transform_4(%arg0: i32) -> (i32, i32) {
    %c0_i32 = arith.constant 0 : i32
    %c0_i32_0 = arith.constant 0 : i32
    %c0_i32_1 = arith.constant 0 : i32
    return %c0_i32, %c0_i32_0 : i32, i32
  }
  func.func @transform_5(%arg0: i32) -> (i32, i32) {
    %c0_i32 = arith.constant 0 : i32
    %c0_i32_0 = arith.constant 0 : i32
    %c0_i32_1 = arith.constant 0 : i32
    return %c0_i32, %c0_i32_0 : i32, i32
  }
  func.func @transform_6(%arg0: i32) -> (i32, i32) {
    %c0_i32 = arith.constant 0 : i32
    %c0_i32_0 = arith.constant 0 : i32
    return %arg0, %c0_i32 : i32, i32
  }
}

</mosaic_0001>

<bundles_post_ra>
// kernel: basic_block_forward.4
= control target key start
LH: loop header
LB: loop body
LE: loop exit
PB: predicated region body
PF: predicated region fallthrough
CT: control target
= control target key end

     0   :  { %s764_s1 = inlined_call_operand.vmem [shape: bf16[128,128], index: 1, kind: input, shape index: {}]   ;;  %s765_s0 = inlined_call_operand.vmem [shape: bf16[128,128], index: 0, kind: input, shape index: {}]   ;;  %s766_s2 = inlined_call_operand.vmem [shape: bf16[128,128], index: 2, kind: output, shape index: {0}]   ;;  %s767_s3 = inlined_call_operand.vmem [shape: f32[1,1,128], index: 3, kind: output, shape index: {1}]   ;;  %s768_s4 = inlined_call_operand.vmem [shape: f32[1,1,128], index: 4, kind: output, shape index: {2}]  }
   0x1   :  { %v645_v0 = vld [vmem:[%s764_s1] sm:$0xff]   ;;  %v646_v1 = vld [vmem:[%s764_s1 + $0x8] sm:$0xff]   ;;  %v647_v2 = vld [vmem:[%s764_s1 + $0x10] sm:$0xff]  }
   0x2   :  { %597 = vmatprep.subr.bf16.mxu0 %v645_v0  ;;  %629 = vmatprep.subr.bf16.mxu1 %v645_v0  ;;  %v648_v3 = vld [vmem:[%s764_s1 + $0x18] sm:$0xff]   ;;  %v653_v4 = vld [vmem:[%s765_s0] sm:$0xff]   ;;  %v650_v7 = vld [vmem:[%s764_s1 + $0x28] sm:$0xff]  }
   0x3   :  { %598 = vmatpush3.bf16.msra.mxu0 %v645_v0  ;;  %637 = vmatpush3.bf16.msra.mxu1 %v645_v0  ;;  %v649_v5 = vld [vmem:[%s764_s1 + $0x20] sm:$0xff]   ;;  %v651_v8 = vld [vmem:[%s764_s1 + $0x30] sm:$0xff]   ;;  %v652_v9 = vld [vmem:[%s764_s1 + $0x38] sm:$0xff]  }
   0x4   :  { %599 = vmatprep.subr.bf16.mxu0 %v646_v1  ;;  %630 = vmatprep.subr.bf16.mxu1 %v646_v1  ;;  %v657_v6 = vld [vmem:[%s765_s0 + $0x20] sm:$0xff]   ;;  %v654_v10 = vld [vmem:[%s765_s0 + $0x8] sm:$0xff]   ;;  %v655_v12 = vld [vmem:[%s765_s0 + $0x10] sm:$0xff]  }
   0x5   :  { %613 = vmatprep.mubr.bf16.mxu0 %v653_v4  ;;  %621 = vmatprep.mubr.bf16.mxu1 %v657_v6  ;;  %v658_v11 = vld [vmem:[%s765_s0 + $0x28] sm:$0xff]   ;;  %v659_v13 = vld [vmem:[%s765_s0 + $0x30] sm:$0xff]   ;;  %v656_v14 = vld [vmem:[%s765_s0 + $0x18] sm:$0xff]  }
   0x6   :  { %v660_v15 = vld [vmem:[%s765_s0 + $0x38] sm:$0xff]  }
   0x7   :  { %600 = vmatpush3.bf16.msra.mxu0 %v646_v1  ;;  %638 = vmatpush3.bf16.msra.mxu1 %v646_v1 }
   0x8   :  { %601 = vmatprep.subr.bf16.mxu0 %v647_v2  ;;  %631 = vmatprep.subr.bf16.mxu1 %v647_v2 }
   0xb   :  { %602 = vmatpush3.bf16.msra.mxu0 %v647_v2  ;;  %639 = vmatpush3.bf16.msra.mxu1 %v647_v2 }
   0xc   :  { %603 = vmatprep.subr.bf16.mxu0 %v648_v3  ;;  %632 = vmatprep.subr.bf16.mxu1 %v648_v3 }
   0xf   :  { %604 = vmatpush3.bf16.msra.mxu0 %v648_v3  ;;  %640 = vmatpush3.bf16.msra.mxu1 %v648_v3 }
  0x10   :  { %605 = vmatprep.subr.bf16.mxu0 %v649_v5  ;;  %633 = vmatprep.subr.bf16.mxu1 %v649_v5 }
  0x13   :  { %606 = vmatpush3.bf16.msra.mxu0 %v649_v5  ;;  %641 = vmatpush3.bf16.msra.mxu1 %v649_v5 }
  0x14   :  { %607 = vmatprep.subr.bf16.mxu0 %v650_v7  ;;  %634 = vmatprep.subr.bf16.mxu1 %v650_v7 }
  0x17   :  { %608 = vmatpush3.bf16.msra.mxu0 %v650_v7  ;;  %642 = vmatpush3.bf16.msra.mxu1 %v650_v7 }
  0x18   :  { %609 = vmatprep.subr.bf16.mxu0 %v651_v8  ;;  %635 = vmatprep.subr.bf16.mxu1 %v651_v8 }
  0x1b   :  { %610 = vmatpush3.bf16.msra.mxu0 %v651_v8  ;;  %643 = vmatpush3.bf16.msra.mxu1 %v651_v8 }
  0x1c   :  { %611 = vmatprep.subr.bf16.mxu0 %v652_v9  ;;  %636 = vmatprep.subr.bf16.mxu1 %v652_v9 }
  0x1f   :  { %612 = vmatpush3.bf16.msra.mxu0 %v652_v9  ;;  %644 = vmatpush3.bf16.msra.mxu1 %v652_v9 }
  0x22   :  { %614 = vmatmul.mubr.bf16.vlgmr.msra.gmra.mrb[0].mxu0 %v654_v10  ;;  %622 = vmatmul.mubr.bf16.vlgmr.msra.gmra.mrb[0].mxu1 %v658_v11 }
  0x23   :  { %617 = vmatprep.mubr.bf16.mxu0 %v655_v12  ;;  %625 = vmatprep.mubr.bf16.mxu1 %v659_v13 }
  0x2a   :  { %618 = vmatmul.mubr.bf16.gmra.mrb[4].mxu0 %v656_v14  ;;  %626 = vmatmul.mubr.bf16.gmra.mrb[4].mxu1 %v660_v15 }
  0xf5   :  { %v615_v16 = vpop.f32.mrb[0].mxu0  ;;  %v623_v17 = vpop.f32.mrb[0].mxu1 }
  0xf6   :  { %v218_v18 = vpop.f32.mrb[1].mxu0  ;;  %v250_v19 = vpop.f32.mrb[1].mxu1  ;;  %v436_v31 = vmul.f32 %v615_v16, %v615_v16  ;;  %v444_v3 = vmul.f32 %v623_v17, %v623_v17 }
  0xf7   :  { %v616_v20 = vpop.f32.mrb[2].mxu0  ;;  %v624_v21 = vpop.f32.mrb[2].mxu1  ;;  %v434_v22 = vmul.f32 %v218_v18, %v218_v18  ;;  %v442_v61 = vmul.f32 %v250_v19, %v250_v19 }
  0xf8   :  { %v542_v23 = vpack.c.bf16 %v616_v20, %v615_v16  ;;  %v221_v24 = vpop.f32.mrb[3].mxu0  ;;  %v562_v25 = vpack.c.bf16 %v624_v21, %v623_v17  ;;  %v253_v26 = vpop.f32.mrb[3].mxu1  ;;  %v437_v34 = vmul.f32 %v616_v20, %v616_v20  ;;  %v445_v6 = vmul.f32 %v624_v21, %v624_v21 }
  0xf9   :  { %v537_v27 = vpack.c.bf16 %v221_v24, %v218_v18  ;;  %v412_v28 = vadd.f32 %v221_v24, %v218_v18  ;;  %v435_v29 = vmul.f32 %v221_v24, %v221_v24  ;;  %v557_v30 = vpack.c.bf16 %v253_v26, %v250_v19 }
  0xfa   :  { %574 = vst [vmem:[%s766_s2 + $0x8] sm:$0xff] %v542_v23   ;;  %578 = vst [vmem:[%s766_s2 + $0x28] sm:$0xff] %v562_v25   ;;  %v443_v2 = vmul.f32 %v253_v26, %v253_v26 }
  0xfb   :  { %538 = vst [vmem:[%s766_s2] sm:$0xff] %v537_v27   ;;  %v413_v32 = vadd.f32 %v615_v16, %v412_v28  ;;  %v450_v33 = vadd.f32 %v435_v29, %v434_v22  ;;  %577 = vst [vmem:[%s766_s2 + $0x20] sm:$0xff] %v557_v30  }
  0xfd   :  { %v451_v35 = vadd.f32 %v450_v33, %v436_v31  ;;  %v619_v36 = vpop.f32.mrb[4].mxu0  ;;  %v414_v37 = vadd.f32 %v616_v20, %v413_v32  ;;  %v627_v38 = vpop.f32.mrb[4].mxu1 }
  0xfe   :  { %v234_v39 = vpop.f32.mrb[5].mxu0  ;;  %v266_v40 = vpop.f32.mrb[5].mxu1  ;;  %v440_v55 = vmul.f32 %v619_v36, %v619_v36  ;;  %v448_v15 = vmul.f32 %v627_v38, %v627_v38 }
  0xff   :  { %v415_v41 = vadd.f32 %v414_v37, %v234_v39  ;;  %v438_v42 = vmul.f32 %v234_v39, %v234_v39  ;;  %v452_v43 = vadd.f32 %v451_v35, %v437_v34  ;;  %v620_v44 = vpop.f32.mrb[6].mxu0  ;;  %v628_v45 = vpop.f32.mrb[6].mxu1  ;;  %v446_v9 = vmul.f32 %v266_v40, %v266_v40 }
 0x100   :  { %v552_v46 = vpack.c.bf16 %v620_v44, %v619_v36  ;;  %v237_v47 = vpop.f32.mrb[7].mxu0  ;;  %v572_v48 = vpack.c.bf16 %v628_v45, %v627_v38  ;;  %v269_v49 = vpop.f32.mrb[7].mxu1  ;;  %v441_v58 = vmul.f32 %v620_v44, %v620_v44 }
 0x101   :  { %v453_v50 = vadd.f32 %v452_v43, %v438_v42  ;;  %v547_v51 = vpack.c.bf16 %v237_v47, %v234_v39  ;;  %v416_v52 = vadd.f32 %v415_v41, %v237_v47  ;;  %v439_v53 = vmul.f32 %v237_v47, %v237_v47 }
 0x102   :  { %576 = vst [vmem:[%s766_s2 + $0x18] sm:$0xff] %v552_v46   ;;  %580 = vst [vmem:[%s766_s2 + $0x38] sm:$0xff] %v572_v48   ;;  %v567_v54 = vpack.c.bf16 %v269_v49, %v266_v40  ;;  %v447_v14 = vmul.f32 %v269_v49, %v269_v49 }
 0x103   :  { %575 = vst [vmem:[%s766_s2 + $0x10] sm:$0xff] %v547_v51   ;;  %v417_v56 = vadd.f32 %v619_v36, %v416_v52  ;;  %v454_v57 = vadd.f32 %v453_v50, %v439_v53 }
 0x104   :  { %579 = vst [vmem:[%s766_s2 + $0x30] sm:$0xff] %v567_v54  }
 0x105   :  { %v455_v59 = vadd.f32 %v454_v57, %v440_v55  ;;  %v418_v60 = vadd.f32 %v620_v44, %v417_v56 }
 0x107   :  { %v419_v62 = vadd.f32 %v418_v60, %v250_v19  ;;  %v456_v63 = vadd.f32 %v455_v59, %v441_v58  ;;  %v449_v19 = vmul.f32 %v628_v45, %v628_v45 }
 0x109   :  { %v457_v0 = vadd.f32 %v456_v63, %v442_v61  ;;  %v420_v1 = vadd.f32 %v419_v62, %v253_v26 }
 0x10b   :  { %v421_v4 = vadd.f32 %v623_v17, %v420_v1  ;;  %v458_v5 = vadd.f32 %v457_v0, %v443_v2 }
 0x10d   :  { %v459_v7 = vadd.f32 %v458_v5, %v444_v3  ;;  %v422_v8 = vadd.f32 %v624_v21, %v421_v4 }
 0x10f   :  { %v423_v10 = vadd.f32 %v422_v8, %v266_v40  ;;  %v460_v11 = vadd.f32 %v459_v7, %v445_v6 }
 0x111   :  { %v461_v12 = vadd.f32 %v460_v11, %v446_v9  ;;  %v424_v13 = vadd.f32 %v423_v10, %v269_v49 }
 0x113   :  { %v425_v16 = vadd.f32 %v627_v38, %v424_v13  ;;  %v462_v18 = vadd.f32 %v461_v12, %v447_v14 }
 0x115   :  { %v426_v20 = vadd.f32 %v628_v45, %v425_v16  ;;  %v463_v22 = vadd.f32 %v462_v18, %v448_v15 }
 0x117   :  { %v427_v23 = vrot.slane %v426_v20, 4  ;;  %v464_v24 = vadd.f32 %v463_v22, %v449_v19 }
 0x119   :  { %v428_v25 = vadd.f32 %v427_v23, %v426_v20  ;;  %v465_v17 = vrot.slane %v464_v24, 4 }
 0x11b   :  { %v429_v26 = vrot.slane %v428_v25, 2  ;;  %v466_v27 = vadd.f32 %v465_v17, %v464_v24 }
 0x11d   :  { %v430_v28 = vadd.f32 %v429_v26, %v428_v25  ;;  %v467_v21 = vrot.slane %v466_v27, 2 }
 0x11f   :  { %v431_v29 = vrot.slane %v430_v28, 1  ;;  %v468_v30 = vadd.f32 %v467_v21, %v466_v27 }
 0x121   :  { %v432_v31 = vadd.f32 %v431_v29, %v430_v28  ;;  %v469_v32 = vrot.slane %v468_v30, 1 }
 0x123   :  { %433 = vst [vmem:[%s767_s3] sm:$0x1] %v432_v31  ;;  %v470_v33 = vadd.f32 %v469_v32, %v468_v30 }
 0x125   :  { %471 = vst [vmem:[%s768_s4] sm:$0x1] %v470_v33 }

// kernel: basic_block_forward.7
= control target key start
LH: loop header
LB: loop body
LE: loop exit
PB: predicated region body
PF: predicated region fallthrough
CT: control target
= control target key end

     0   :  { %s647_s0 = inlined_call_operand.vmem [shape: bf16[128,128], index: 0, kind: input, shape index: {}]   ;;  %s648_s1 = inlined_call_operand.vmem [shape: bf16[128,128], index: 1, kind: input, shape index: {}]   ;;  %s649_s2 = inlined_call_operand.vmem [shape: f32[1,128], index: 2, kind: input, shape index: {}]   ;;  %s650_s3 = inlined_call_operand.vmem [shape: f32[1,128], index: 3, kind: input, shape index: {}]   ;;  %s651_s4 = inlined_call_operand.vmem [shape: f32[1,128], index: 4, kind: input, shape index: {}]   ;;  %s652_s5 = inlined_call_operand.vmem [shape: f32[1,128], index: 5, kind: input, shape index: {}]   ;;  %s653_s6 = inlined_call_operand.vmem [shape: bf16[128,128], index: 6, kind: output, shape index: {}]  }
   0x1   :  { %v332_v0 = vld [vmem:[%s647_s0] sm:$0xff]   ;;  %v435_v9 = vld [vmem:[%s647_s0 + $0x8] sm:$0xff]   ;;  %v436_v20 = vld [vmem:[%s647_s0 + $0x10] sm:$0xff]  }
   0x2   :  { %v497_v1 = vld [vmem:[%s649_s2] ss:$0 sm:$0xff]  ;;  %v333_v2 = vunpack.c.l.bf16 %v332_v0  ;;  %v334_v3 = vunpack.c.h.bf16 %v332_v0  ;;  %v442_v10 = vld [vmem:[%s648_s1 + $0x8] sm:$0xff]   ;;  %v337_v14 = vunpack.c.l.bf16 %v435_v9  ;;  %v338_v15 = vunpack.c.h.bf16 %v435_v9  ;;  %v443_v29 = vld [vmem:[%s648_s1 + $0x10] sm:$0xff]  }
   0x3   :  { %v364_v4 = vld [vmem:[%s648_s1] sm:$0xff]   ;;  %v369_v18 = vunpack.c.l.bf16 %v442_v10  ;;  %v370_v19 = vunpack.c.h.bf16 %v442_v10  ;;  %v341_v32 = vunpack.c.l.bf16 %v436_v20  ;;  %v342_v33 = vunpack.c.h.bf16 %v436_v20  ;;  %v437_v42 = vld [vmem:[%s647_s0 + $0x18] sm:$0xff]  }
   0x4   :  { %v505_v5 = vld [vmem:[%s651_s4] ss:$0 sm:$0xff]  ;;  %v365_v7 = vunpack.c.l.bf16 %v364_v4  ;;  %v366_v8 = vunpack.c.h.bf16 %v364_v4  ;;  %v62_v11 = vmul.f32 %v333_v2, %v497_v1  ;;  %v63_v12 = vmul.f32 %v334_v3, %v497_v1  ;;  %v444_v47 = vld [vmem:[%s648_s1 + $0x18] sm:$0xff]  }
   0x5   :  { %v510_v6 = vld [vmem:[%s650_s3] ss:$0 sm:$0xff]  ;;  %v64_v23 = vmul.f32 %v337_v14, %v497_v1  ;;  %v65_v24 = vmul.f32 %v338_v15, %v497_v1  ;;  %v142_v27 = vmul.f32 %v369_v18, %v505_v5  ;;  %v143_v28 = vmul.f32 %v370_v19, %v505_v5  ;;  %v439_v14 = vld [vmem:[%s647_s0 + $0x28] sm:$0xff]  }
   0x6   :  { %v523_v13 = vld [vmem:[%s652_s5] ss:$0 sm:$0xff]  ;;  %v140_v16 = vmul.f32 %v365_v7, %v505_v5  ;;  %v141_v17 = vmul.f32 %v366_v8, %v505_v5  ;;  %v85_v21 = vadd.f32 %v510_v6, %v62_v11  ;;  %v86_v22 = vadd.f32 %v510_v6, %v63_v12 }
   0x7   :  { %v87_v30 = vadd.f32 %v510_v6, %v64_v23  ;;  %v88_v31 = vadd.f32 %v510_v6, %v65_v24  ;;  %v165_v36 = vadd.f32 %v523_v13, %v142_v27  ;;  %v166_v37 = vadd.f32 %v523_v13, %v143_v28  ;;  %v438_v52 = vld [vmem:[%s647_s0 + $0x20] sm:$0xff]   ;;  %v446_v23 = vld [vmem:[%s648_s1 + $0x28] sm:$0xff]  }
   0x8   :  { %v163_v25 = vadd.f32 %v523_v13, %v140_v16  ;;  %v164_v26 = vadd.f32 %v523_v13, %v141_v17  ;;  %v66_v38 = vmul.f32 %v341_v32, %v497_v1  ;;  %v67_v39 = vmul.f32 %v342_v33, %v497_v1  ;;  %v445_v8 = vld [vmem:[%s648_s1 + $0x20] sm:$0xff]   ;;  %v440_v32 = vld [vmem:[%s647_s0 + $0x30] sm:$0xff]  }
   0x9   :  { %v373_v40 = vunpack.c.l.bf16 %v443_v29  ;;  %v374_v41 = vunpack.c.h.bf16 %v443_v29  ;;  %v181_v45 = vadd.f32 %v165_v36, %v87_v30  ;;  %v182_v46 = vadd.f32 %v166_v37, %v88_v31 }
   0xa   :  { %v179_v34 = vadd.f32 %v163_v25, %v85_v21  ;;  %v180_v35 = vadd.f32 %v164_v26, %v86_v22  ;;  %v89_v48 = vadd.f32 %v510_v6, %v66_v38  ;;  %v90_v49 = vadd.f32 %v510_v6, %v67_v39 }
   0xb   :  { %v144_v50 = vmul.f32 %v373_v40, %v505_v5  ;;  %v145_v51 = vmul.f32 %v374_v41, %v505_v5  ;;  %v197_v54 = vmax.f32 %v181_v45, 0.0  ;;  %v198_v55 = vmax.f32 %v182_v46, 0.0  ;;  %v447_v45 = vld [vmem:[%s648_s1 + $0x30] sm:$0xff]  }
   0xc   :  { %v195_v43 = vmax.f32 %v179_v34, 0.0  ;;  %v196_v44 = vmax.f32 %v180_v35, 0.0  ;;  %v345_v56 = vunpack.c.l.bf16 %v437_v42  ;;  %v346_v59 = vunpack.c.h.bf16 %v437_v42 }
   0xd   :  { %v167_v57 = vadd.f32 %v523_v13, %v144_v50  ;;  %v168_v58 = vadd.f32 %v523_v13, %v145_v51  ;;  %v377_v60 = vunpack.c.l.bf16 %v444_v47  ;;  %v403_v61 = vpack.c.bf16 %v198_v55, %v197_v54  ;;  %v441_v54 = vld [vmem:[%s647_s0 + $0x38] sm:$0xff]  }
   0xe   :  { %v398_v53 = vpack.c.bf16 %v196_v44, %v195_v43  ;;  %v68_v62 = vmul.f32 %v345_v56, %v497_v1  ;;  %v378_v63 = vunpack.c.h.bf16 %v444_v47  ;;  %v349_v0 = vunpack.c.l.bf16 %v438_v52 }
   0xf   :  { %v183_v2 = vadd.f32 %v167_v57, %v89_v48  ;;  %v184_v3 = vadd.f32 %v168_v58, %v90_v49  ;;  %v69_v4 = vmul.f32 %v346_v59, %v497_v1  ;;  %v146_v7 = vmul.f32 %v377_v60, %v505_v5  ;;  %449 = vst [vmem:[%s653_s6 + $0x8] sm:$0xff] %v403_v61  }
  0x10   :  { %399 = vst [vmem:[%s653_s6] sm:$0xff] %v398_v53   ;;  %v91_v9 = vadd.f32 %v510_v6, %v68_v62  ;;  %v147_v10 = vmul.f32 %v378_v63, %v505_v5  ;;  %v350_v11 = vunpack.c.h.bf16 %v438_v52  ;;  %v70_v12 = vmul.f32 %v349_v0, %v497_v1 }
  0x11   :  { %v199_v15 = vmax.f32 %v183_v2, 0.0  ;;  %v200_v16 = vmax.f32 %v184_v3, 0.0  ;;  %v92_v17 = vadd.f32 %v510_v6, %v69_v4  ;;  %v169_v18 = vadd.f32 %v523_v13, %v146_v7  ;;  %v448_v4 = vld [vmem:[%s648_s1 + $0x38] sm:$0xff]  }
  0x12   :  { %v170_v19 = vadd.f32 %v523_v13, %v147_v10  ;;  %v71_v20 = vmul.f32 %v350_v11, %v497_v1  ;;  %v93_v21 = vadd.f32 %v510_v6, %v70_v12  ;;  %v381_v22 = vunpack.c.l.bf16 %v445_v8 }
  0x13   :  { %v408_v24 = vpack.c.bf16 %v200_v16, %v199_v15  ;;  %v185_v25 = vadd.f32 %v169_v18, %v91_v9  ;;  %v382_v26 = vunpack.c.h.bf16 %v445_v8  ;;  %v353_v27 = vunpack.c.l.bf16 %v439_v14 }
  0x14   :  { %v186_v28 = vadd.f32 %v170_v19, %v92_v17  ;;  %v94_v29 = vadd.f32 %v510_v6, %v71_v20  ;;  %v148_v30 = vmul.f32 %v381_v22, %v505_v5  ;;  %v354_v31 = vunpack.c.h.bf16 %v439_v14 }
  0x15   :  { %450 = vst [vmem:[%s653_s6 + $0x10] sm:$0xff] %v408_v24   ;;  %v201_v33 = vmax.f32 %v185_v25, 0.0  ;;  %v149_v34 = vmul.f32 %v382_v26, %v505_v5  ;;  %v72_v35 = vmul.f32 %v353_v27, %v497_v1  ;;  %v385_v36 = vunpack.c.l.bf16 %v446_v23 }
  0x16   :  { %v202_v37 = vmax.f32 %v186_v28, 0.0  ;;  %v171_v38 = vadd.f32 %v523_v13, %v148_v30  ;;  %v73_v39 = vmul.f32 %v354_v31, %v497_v1  ;;  %v386_v40 = vunpack.c.h.bf16 %v446_v23 }
  0x17   :  { %v172_v41 = vadd.f32 %v523_v13, %v149_v34  ;;  %v95_v42 = vadd.f32 %v510_v6, %v72_v35  ;;  %v150_v43 = vmul.f32 %v385_v36, %v505_v5  ;;  %v357_v44 = vunpack.c.l.bf16 %v440_v32 }
  0x18   :  { %v413_v46 = vpack.c.bf16 %v202_v37, %v201_v33  ;;  %v187_v47 = vadd.f32 %v171_v38, %v93_v21  ;;  %v96_v48 = vadd.f32 %v510_v6, %v73_v39  ;;  %v151_v49 = vmul.f32 %v386_v40, %v505_v5 }
  0x19   :  { %v188_v50 = vadd.f32 %v172_v41, %v94_v29  ;;  %v173_v51 = vadd.f32 %v523_v13, %v150_v43  ;;  %v358_v52 = vunpack.c.h.bf16 %v440_v32  ;;  %v74_v53 = vmul.f32 %v357_v44, %v497_v1 }
  0x1a   :  { %451 = vst [vmem:[%s653_s6 + $0x18] sm:$0xff] %v413_v46   ;;  %v203_v55 = vmax.f32 %v187_v47, 0.0  ;;  %v174_v56 = vadd.f32 %v523_v13, %v151_v49  ;;  %v389_v57 = vunpack.c.l.bf16 %v447_v45  ;;  %v390_v58 = vunpack.c.h.bf16 %v447_v45 }
  0x1b   :  { %v204_v59 = vmax.f32 %v188_v50, 0.0  ;;  %v189_v60 = vadd.f32 %v173_v51, %v95_v42  ;;  %v75_v61 = vmul.f32 %v358_v52, %v497_v1  ;;  %v97_v62 = vadd.f32 %v510_v6, %v74_v53 }
  0x1c   :  { %v190_v63 = vadd.f32 %v174_v56, %v96_v48  ;;  %v152_v0 = vmul.f32 %v389_v57, %v505_v5  ;;  %v153_v2 = vmul.f32 %v390_v58, %v505_v5  ;;  %v361_v3 = vunpack.c.l.bf16 %v441_v54 }
  0x1d   :  { %v418_v7 = vpack.c.bf16 %v204_v59, %v203_v55  ;;  %v205_v8 = vmax.f32 %v189_v60, 0.0  ;;  %v98_v9 = vadd.f32 %v510_v6, %v75_v61  ;;  %v362_v10 = vunpack.c.h.bf16 %v441_v54 }
  0x1e   :  { %v206_v11 = vmax.f32 %v190_v63, 0.0  ;;  %v175_v12 = vadd.f32 %v523_v13, %v152_v0  ;;  %v176_v14 = vadd.f32 %v523_v13, %v153_v2  ;;  %v76_v15 = vmul.f32 %v361_v3, %v497_v1 }
  0x1f   :  { %452 = vst [vmem:[%s653_s6 + $0x20] sm:$0xff] %v418_v7   ;;  %v77_v16 = vmul.f32 %v362_v10, %v497_v1  ;;  %v393_v17 = vunpack.c.l.bf16 %v448_v4  ;;  %v394_v18 = vunpack.c.h.bf16 %v448_v4 }
  0x20   :  { %v423_v19 = vpack.c.bf16 %v206_v11, %v205_v8  ;;  %v191_v20 = vadd.f32 %v175_v12, %v97_v62  ;;  %v192_v21 = vadd.f32 %v176_v14, %v98_v9  ;;  %v99_v22 = vadd.f32 %v510_v6, %v76_v15 }
  0x21   :  { %v100_v23 = vadd.f32 %v510_v6, %v77_v16  ;;  %v154_v24 = vmul.f32 %v393_v17, %v505_v5  ;;  %v155_v25 = vmul.f32 %v394_v18, %v505_v5 }
  0x22   :  { %453 = vst [vmem:[%s653_s6 + $0x28] sm:$0xff] %v423_v19   ;;  %v207_v26 = vmax.f32 %v191_v20, 0.0  ;;  %v208_v27 = vmax.f32 %v192_v21, 0.0 }
  0x23   :  { %v177_v1 = vadd.f32 %v523_v13, %v154_v24  ;;  %v178_v28 = vadd.f32 %v523_v13, %v155_v25 }
  0x24   :  { %v428_v29 = vpack.c.bf16 %v208_v27, %v207_v26 }
  0x25   :  { %v193_v30 = vadd.f32 %v177_v1, %v99_v22  ;;  %v194_v31 = vadd.f32 %v178_v28, %v100_v23 }
  0x26   :  { %454 = vst [vmem:[%s653_s6 + $0x30] sm:$0xff] %v428_v29  }
  0x27   :  { %v209_v6 = vmax.f32 %v193_v30, 0.0  ;;  %v210_v32 = vmax.f32 %v194_v31, 0.0 }
  0x29   :  { %v433_v5 = vpack.c.bf16 %v210_v32, %v209_v6 }
  0x2b   :  { %455 = vst [vmem:[%s653_s6 + $0x38] sm:$0xff] %v433_v5  }

</bundles_post_ra>
